<compile_context>
chip_gen: v7x
topology: tpu7x:2x2x1
jax: 0.10.0
libtpu: 0.0.40
codegen_flags: <defaults>
</compile_context>

<pallas_src>
import jax
import jax.numpy as jnp
from jax.experimental import pallas as pl
from jax.experimental.pallas import tpu as pltpu


# ----------------------------------------------------------------------------
# One-time weight preparation (outside the per-forward hot path).
# ----------------------------------------------------------------------------
def prepare_lane_dense_weights(center_vector, context_vectors):
    """center_vector (1,E,V), context_vectors (1,V,E) -> center_t (V,Ep), context_t (Ep,V).

    V stays on the lane axis everywhere.  E is zero-padded to a multiple of 8
    (f32 sublane granularity); the zero rows/cols do not change the
    E-contraction, so results are bit-equivalent to the unpadded math.
    """
    center_t = jnp.transpose(center_vector[0]).astype(jnp.float32)      # (V, E)
    context_t = jnp.transpose(context_vectors[0]).astype(jnp.float32)   # (E, V)
    e = center_t.shape[1]
    e_pad = max(8, pl.cdiv(e, 8) * 8)
    if e_pad != e:
        center_t = jnp.pad(center_t, ((0, 0), (0, e_pad - e)))
        context_t = jnp.pad(context_t, ((0, e_pad - e), (0, 0)))
    return center_t, context_t


def precompute_score_table(center_t, context_t):
    """One-time (per weight update): score_table[i, :] == forward(one_hot(i)).T.

    (V, V) f32 table (256 KB for V=256).  With static weights the whole forward
    collapses to a row gather of this table (see word2vec_forward_table).
    """
    return jnp.dot(center_t, context_t, precision=jax.lax.Precision.HIGHEST)


# ----------------------------------------------------------------------------
# Kernel 1: general dense x (exact module semantics, two MXU matmuls).
# ----------------------------------------------------------------------------
def _dense_kernel(x_ref, center_t_ref, context_t_ref, out_ref):
    # (B, V) @ (V, E) -> (B, E)
    hidden = jnp.dot(x_ref[...], center_t_ref[...],
                     preferred_element_type=jnp.float32)
    # (B, E) @ (E, V) -> (B, V)   (lane-dense, unmasked vst)
    out_ref[...] = jnp.dot(hidden, context_t_ref[...],
                           preferred_element_type=jnp.float32)


@jax.jit
def word2vec_forward_dense(center_t, context_t, x_bv):
    """x_bv: (B, V) == x[0].T.  Returns (B, V) == forward(x)[0].T (lane-dense)."""
    V, E = center_t.shape
    B = x_bv.shape[0]
    b_pad = max(8, pl.cdiv(B, 8) * 8)
    if b_pad != B:
        x_bv = jnp.pad(x_bv, ((0, b_pad - B), (0, 0)))

    flops = 2 * b_pad * V * E + 2 * b_pad * E * V
    bytes_accessed = 4 * (b_pad * V + V * E + E * V + b_pad * V)

    out = pl.pallas_call(
        _dense_kernel,
        out_shape=jax.ShapeDtypeStruct((b_pad, V), jnp.float32),
        in_specs=[
            pl.BlockSpec((b_pad, V), lambda: (0, 0)),
            pl.BlockSpec((V, E), lambda: (0, 0)),
            pl.BlockSpec((E, V), lambda: (0, 0)),
        ],
        out_specs=pl.BlockSpec((b_pad, V), lambda: (0, 0)),
        cost_estimate=pl.CostEstimate(
            flops=flops, transcendentals=0, bytes_accessed=bytes_accessed),
    )(x_bv, center_t, context_t)
    return out[:B]


@jax.jit
def word2vec_forward(center_vector, context_vectors, x):
    """Drop-in module-layout forward: x (1, V, B) -> (1, V, B).

    Convenience wrapper only — the transposes here are exactly the layout
    plumbing the hot path should avoid.  Hot-path callers should prepare the
    lane-dense weights once and call word2vec_forward_dense /
    word2vec_forward_onehot, which also return lane-dense (B, V) directly.
    """
    center_t, context_t = prepare_lane_dense_weights(center_vector, context_vectors)
    out_bv = word2vec_forward_dense(center_t, context_t, jnp.transpose(x[0]))
    return jnp.transpose(out_bv)[None, :, :]


# ----------------------------------------------------------------------------
# Kernel 2: one-hot fast path — gather B embedding rows from HBM, one matmul.
# ----------------------------------------------------------------------------
def _onehot_gather_kernel(idx_ref, center_t_hbm, context_t_ref, out_ref,
                          gath_ref, sem):
    n = gath_ref.shape[0]
    # Gather the requested embedding rows straight from HBM (E*4 bytes each).
    for b in range(n):                                   # static unroll (small n)
        pltpu.make_async_copy(center_t_hbm.at[idx_ref[b]], gath_ref.at[b],
                              sem.at[b]).start()
    for b in range(n):
        pltpu.make_async_copy(center_t_hbm.at[idx_ref[b]], gath_ref.at[b],
                              sem.at[b]).wait()
    # Single remaining MXU matmul: (B, E) @ (E, V) -> (B, V).
    out_ref[...] = jnp.dot(gath_ref[...], context_t_ref[...],
                           preferred_element_type=jnp.float32)


@jax.jit
def word2vec_forward_onehot(center_t, context_t, idx):
    """Equivalent to forward(one_hot(idx)) when x is one-hot. Returns (B, V).

    NOTE: if x can be a dense distribution over the vocab, use
    word2vec_forward_dense instead.
    """
    V, E = center_t.shape
    B = idx.shape[0]
    idx = idx.astype(jnp.int32)
    b_pad = max(8, pl.cdiv(B, 8) * 8)
    if b_pad != B:
        idx = jnp.pad(idx, (0, b_pad - B))               # padded rows gather row 0

    out = pl.pallas_call(
        _onehot_gather_kernel,
        out_shape=jax.ShapeDtypeStruct((b_pad, V), jnp.float32),
        in_specs=[
            pl.BlockSpec(memory_space=pltpu.MemorySpace.SMEM),   # idx -> SMEM scalars
            pl.BlockSpec(memory_space=pl.ANY),                   # center_t stays in HBM
            pl.BlockSpec((E, V), lambda: (0, 0)),                # context_t -> VMEM
        ],
        out_specs=pl.BlockSpec((b_pad, V), lambda: (0, 0)),
        scratch_shapes=[
            pltpu.VMEM((b_pad, E), jnp.float32),
            pltpu.SemaphoreType.DMA((b_pad,)),
        ],
        cost_estimate=pl.CostEstimate(
            flops=2 * b_pad * E * V, transcendentals=0,
            bytes_accessed=4 * (b_pad * E + E * V + b_pad * V) + 4 * b_pad),
    )(idx, center_t, context_t)
    return out[:B]


# ----------------------------------------------------------------------------
# Kernel 3: static-weight inference floor — pure row gather of the score table.
# ----------------------------------------------------------------------------
def _table_row_gather_kernel(idx_ref, table_hbm, out_ref, sem):
    n = out_ref.shape[0]
    for b in range(n):                                   # static unroll (small n)
        pltpu.make_async_copy(table_hbm.at[idx_ref[b]], out_ref.at[b],
                              sem.at[b]).start()
    for b in range(n):
        pltpu.make_async_copy(table_hbm.at[idx_ref[b]], out_ref.at[b],
                              sem.at[b]).wait()


@jax.jit
def word2vec_forward_table(score_table, idx):
    """forward(one_hot(idx)).T via a pure B-row DMA gather of the (V,V) table."""
    V = score_table.shape[0]
    B = idx.shape[0]
    idx = idx.astype(jnp.int32)
    b_pad = max(8, pl.cdiv(B, 8) * 8)
    if b_pad != B:
        idx = jnp.pad(idx, (0, b_pad - B))

    out = pl.pallas_call(
        _table_row_gather_kernel,
        out_shape=jax.ShapeDtypeStruct((b_pad, V), jnp.float32),
        in_specs=[
            pl.BlockSpec(memory_space=pltpu.MemorySpace.SMEM),   # idx -> SMEM
            pl.BlockSpec(memory_space=pl.ANY),                   # table stays in HBM
        ],
        out_specs=pl.BlockSpec((b_pad, V), lambda: (0, 0)),
        scratch_shapes=[pltpu.SemaphoreType.DMA((b_pad,))],
        cost_estimate=pl.CostEstimate(
            flops=0, transcendentals=0,
            bytes_accessed=4 * (2 * b_pad * V) + 4 * b_pad),
    )(idx, score_table)
    return out[:B]


# ----------------------------------------------------------------------------
# Synthetic parameter init matching torch.nn.init.xavier_normal_ fan math.
# ----------------------------------------------------------------------------
def xavier_normal(key, shape):
    num_out, num_in = shape[0], shape[1]
    receptive = 1
    for d in shape[2:]:
        receptive *= d
    fan_in = num_in * receptive
    fan_out = num_out * receptive
    std = (2.0 / (fan_in + fan_out)) ** 0.5
    return std * jax.random.normal(key, shape, dtype=jnp.float32)


if __name__ == "__main__":
    VOCAB = 256     # vocab_size
    EMB = 30        # module default emb_dimension (zero-padded to 32 inside prep)
    BATCH = 8       # number of query columns

    key = jax.random.PRNGKey(0)
    k_center, k_context, k_x, k_idx = jax.random.split(key, 4)

    # Parameters in the module's native layout.
    center_vector = xavier_normal(k_center, (1, EMB, VOCAB))       # (1, E, V)
    context_vectors = xavier_normal(k_context, (1, VOCAB, EMB))    # (1, V, E)

    # One-time prep, hoisted out of the per-forward hot path.
    center_t, context_t = prepare_lane_dense_weights(center_vector, context_vectors)
    score_table = precompute_score_table(center_t, context_t)      # (V, V)

    HIGH = jax.lax.Precision.HIGHEST

    # ---- 1) General dense path (arbitrary x, module layout preserved). ------
    x = jax.random.normal(k_x, (1, VOCAB, BATCH), dtype=jnp.float32)
    out_mod = jax.block_until_ready(word2vec_forward(center_vector, context_vectors, x))
    ref_mod = jnp.matmul(context_vectors,
                         jnp.matmul(center_vector, x, precision=HIGH),
                         precision=HIGH)
    assert out_mod.shape == (1, VOCAB, BATCH)
    assert jnp.allclose(out_mod, ref_mod, atol=1e-4, rtol=1e-4)

    # Lane-dense entry point (what hot-path consumers should call).
    out_bv = jax.block_until_ready(
        word2vec_forward_dense(center_t, context_t, jnp.transpose(x[0])))
    assert jnp.allclose(out_bv, jnp.transpose(ref_mod[0]), atol=1e-4, rtol=1e-4)

    # ---- 2) One-hot fast path (indices only; first matmul replaced by gather).
    idx = jax.random.randint(k_idx, (BATCH,), 0, VOCAB, dtype=jnp.int32)
    x_oh = jnp.transpose(jax.nn.one_hot(idx, VOCAB, dtype=jnp.float32))[None]  # ref only
    ref_oh = jnp.matmul(context_vectors,
                        jnp.matmul(center_vector, x_oh, precision=HIGH),
                        precision=HIGH)
    ref_oh_bv = jnp.transpose(ref_oh[0])                                       # (B, V)

    out_gather = jax.block_until_ready(word2vec_forward_onehot(center_t, context_t, idx))
    assert out_gather.shape == (BATCH, VOCAB)
    assert jnp.allclose(out_gather, ref_oh_bv, atol=1e-4, rtol=1e-4)

    # ---- 3) Static-weight inference floor: pure row gather of the table. ----
    out_table = jax.block_until_ready(word2vec_forward_table(score_table, idx))
    assert jnp.allclose(out_table, ref_oh_bv, atol=1e-4, rtol=1e-4)

    print("KERNEL_OK")
</pallas_src>

<mosaic_0001>
module attributes {stable_mosaic.version = 11 : i64} {
  func.func @_dense_kernel(%arg0: memref<8x256xf32, #tpu.memory_space<vmem>>, %arg1: memref<256x32xf32, #tpu.memory_space<vmem>>, %arg2: memref<32x256xf32, #tpu.memory_space<vmem>>, %arg3: memref<8x256xf32, #tpu.memory_space<vmem>>) attributes {dimension_semantics = [], scalar_prefetch = 0 : i64, scratch_operands = 0 : i64, tpu.core_type = #tpu.core_type<tc>} {
    %c0 = arith.constant 0 : index
    %c0_0 = arith.constant 0 : index
    %0 = vector.load %arg0[%c0, %c0_0] : memref<8x256xf32, #tpu.memory_space<vmem>>, vector<8x256xf32>
    %c0_1 = arith.constant 0 : index
    %c0_2 = arith.constant 0 : index
    %1 = vector.load %arg1[%c0_1, %c0_2] : memref<256x32xf32, #tpu.memory_space<vmem>>, vector<256x32xf32>
    %cst = arith.constant dense<0.000000e+00> : vector<8x32xf32>
    %2 = tpu.matmul %0, %1, %cst {dimension_numbers = #tpu.dot_dimension_numbers<[1], [0], [0], [1], [0, 0, 1, 1], [], []>} : vector<8x256xf32>, vector<256x32xf32>, vector<8x32xf32> -> vector<8x32xf32>
    %c0_3 = arith.constant 0 : index
    %c0_4 = arith.constant 0 : index
    %3 = vector.load %arg2[%c0_3, %c0_4] : memref<32x256xf32, #tpu.memory_space<vmem>>, vector<32x256xf32>
    %cst_5 = arith.constant dense<0.000000e+00> : vector<8x256xf32>
    %4 = tpu.matmul %2, %3, %cst_5 {dimension_numbers = #tpu.dot_dimension_numbers<[1], [0], [0], [1], [0, 0, 1, 1], [], []>} : vector<8x32xf32>, vector<32x256xf32>, vector<8x256xf32> -> vector<8x256xf32>
    %c0_6 = arith.constant 0 : index
    %c0_7 = arith.constant 0 : index
    %5 = vector.load %arg3[%c0_6, %c0_7] : memref<8x256xf32, #tpu.memory_space<vmem>>, vector<8x256xf32>
    tpu.vector_store %arg3[%c0_6, %c0_7], %4 {strides = array<i32>} : memref<8x256xf32, #tpu.memory_space<vmem>>, vector<8x256xf32>,
    return
  }
}

</mosaic_0001>

<bundles_post_ra>
// kernel: word2vec_forward_dense.1
= control target key start
LH: loop header
LB: loop body
LE: loop exit
PB: predicated region body
PF: predicated region fallthrough
CT: control target
= control target key end

     0   :  { %s480_s0 = inlined_call_operand.vmem [shape: f32[8,256], index: 0, kind: input, shape index: {}]   ;;  %s481_s1 = inlined_call_operand.vmem [shape: f32[256,32], index: 1, kind: input, shape index: {}]   ;;  %s482_s2 = inlined_call_operand.vmem [shape: f32[32,256], index: 2, kind: input, shape index: {}]   ;;  %s483_s3 = inlined_call_operand.hbm [shape: f32[8,256], index: 3, kind: output, shape index: {}]  }
   0x1   :  { %v33_v0 = vld [vmem:[%s481_s1 + $0x80] sm:$0xff]  ;;  %v34_v1 = vld [vmem:[%s481_s1 + $0x88] sm:$0xff]  ;;  %v35_v5 = vld [vmem:[%s481_s1 + $0x90] sm:$0xff] }
   0x2   :  { %v17_v2 = vld [vmem:[%s481_s1] sm:$0xff]  ;;  %v254_v3 = vpack.c.bf16 %v34_v1, %v33_v0  ;;  %v18_v4 = vld [vmem:[%s481_s1 + $0x8] sm:$0xff]  ;;  %v36_v6 = vld [vmem:[%s481_s1 + $0x98] sm:$0xff] }
   0x3   :  { %v256_v7 = vpack.c.bf16 %v18_v4, %v17_v2  ;;  %v258_v8 = vpack.c.bf16 %v36_v6, %v35_v5  ;;  %v19_v9 = vld [vmem:[%s481_s1 + $0x10] sm:$0xff]  ;;  %v20_v10 = vld [vmem:[%s481_s1 + $0x18] sm:$0xff]  ;;  %v37_v11 = vld [vmem:[%s481_s1 + $0xa0] sm:$0xff] }
   0x4   :  { %255 = vmatprep.subr.bf16.mxu0 %v254_v3  ;;  %v38_v12 = vld [vmem:[%s481_s1 + $0xa8] sm:$0xff]  ;;  %v260_v13 = vpack.c.bf16 %v20_v10, %v19_v9  ;;  %v21_v15 = vld [vmem:[%s481_s1 + $0x20] sm:$0xff]  ;;  %v39_v17 = vld [vmem:[%s481_s1 + $0xb0] sm:$0xff] }
   0x5   :  { %257 = vmatpush3.bf16.msra.mxu0 %v256_v7  ;;  %v262_v14 = vpack.c.bf16 %v38_v12, %v37_v11  ;;  %v22_v16 = vld [vmem:[%s481_s1 + $0x28] sm:$0xff]  ;;  %v40_v18 = vld [vmem:[%s481_s1 + $0xb8] sm:$0xff]  ;;  %v23_v21 = vld [vmem:[%s481_s1 + $0x30] sm:$0xff] }
   0x6   :  { %259 = vmatprep.subr.bf16.mxu0 %v258_v8  ;;  %v264_v19 = vpack.c.bf16 %v22_v16, %v21_v15  ;;  %v266_v20 = vpack.c.bf16 %v40_v18, %v39_v17  ;;  %v24_v22 = vld [vmem:[%s481_s1 + $0x38] sm:$0xff]  ;;  %v41_v23 = vld [vmem:[%s481_s1 + $0xc0] sm:$0xff]  ;;  %v42_v24 = vld [vmem:[%s481_s1 + $0xc8] sm:$0xff] }
   0x7   :  { %v16_v25 = vld [vmem:[%s480_s0 + $0x8] sm:$0xff]  ;;  %v122_v27 = vld [vmem:[%s482_s2 + $0x18] sm:$0xff]  ;;  %v268_v28 = vpack.c.bf16 %v24_v22, %v23_v21  ;;  %v119_v30 = vld [vmem:[%s482_s2] sm:$0xff] }
   0x8   :  { %113 = vmatprep.mubr.f32.mxu0 %v16_v25  ;;  %v120_v26 = vld [vmem:[%s482_s2 + $0x8] sm:$0xff]  ;;  %v121_v31 = vld [vmem:[%s482_s2 + $0x10] sm:$0xff] }
   0x9   :  { %261 = vmatpush3.bf16.msra.mxu0 %v260_v13  ;;  %v286_v29 = vpack.c.bf16 %v122_v27, %v120_v26 }
   0xa   :  { %263 = vmatprep.subr.bf16.mxu0 %v262_v14 }
   0xd   :  { %265 = vmatpush3.bf16.msra.mxu0 %v264_v19 }
   0xe   :  { %8 = vsyncpa [#allocation3], 0  ;;  %267 = vmatprep.subr.bf16.mxu0 %v266_v20  ;;  %v270_v32 = vpack.c.bf16 %v42_v24, %v41_v23  ;;  %v25_v33 = vld [vmem:[%s481_s1 + $0x40] sm:$0xff]  ;;  %v26_v34 = vld [vmem:[%s481_s1 + $0x48] sm:$0xff]  ;;  %v288_v35 = vpack.c.bf16 %v121_v31, %v119_v30  ;;  %287 = vmatprep.subr.bf16.mxu1 %v286_v29  ;;  %v320_v62 = vmov 0.0   ;;  %vm127_vm0 = vcmask 261120  }
   0xf   :  { %v43_v36 = vld [vmem:[%s481_s1 + $0xd0] sm:$0xff]  ;;  %v44_v37 = vld [vmem:[%s481_s1 + $0xd8] sm:$0xff]  ;;  %v272_v38 = vpack.c.bf16 %v26_v34, %v25_v33  ;;  %v45_v42 = vld [vmem:[%s481_s1 + $0xe0] sm:$0xff]  ;;  %195 = vmatprep.mubr.f32.mxu1 %v320_v62 }
  0x10   :  { %289 = vmatpush1.bf16.msra.mxu1 %v288_v35  ;;  %v274_v39 = vpack.c.bf16 %v44_v37, %v43_v36  ;;  %v27_v40 = vld [vmem:[%s481_s1 + $0x50] sm:$0xff]  ;;  %v28_v41 = vld [vmem:[%s481_s1 + $0x58] sm:$0xff]  ;;  %v46_v43 = vld [vmem:[%s481_s1 + $0xe8] sm:$0xff] }
  0x11   :  { %269 = vmatpush3.bf16.msra.mxu0 %v268_v28  ;;  %v276_v44 = vpack.c.bf16 %v28_v41, %v27_v40  ;;  %v278_v45 = vpack.c.bf16 %v46_v43, %v45_v42  ;;  %v29_v46 = vld [vmem:[%s481_s1 + $0x60] sm:$0xff]  ;;  %v30_v47 = vld [vmem:[%s481_s1 + $0x68] sm:$0xff]  ;;  %v47_v48 = vld [vmem:[%s481_s1 + $0xf0] sm:$0xff] }
  0x12   :  { %271 = vmatprep.subr.bf16.mxu0 %v270_v32  ;;  %v48_v49 = vld [vmem:[%s481_s1 + $0xf8] sm:$0xff]  ;;  %v280_v50 = vpack.c.bf16 %v30_v47, %v29_v46  ;;  %v31_v52 = vld [vmem:[%s481_s1 + $0x70] sm:$0xff]  ;;  %v15_v55 = vld [vmem:[%s480_s0] sm:$0xff]  ;;  %s321_s0 = smov [#allocation2]  }
  0x13   :  { %v282_v51 = vpack.c.bf16 %v48_v49, %v47_v48  ;;  %v32_v53 = vld [vmem:[%s481_s1 + $0x78] sm:$0xff]  ;;  %v124_v56 = vld [vmem:[%s482_s2 + $0x28] sm:$0xff]  ;;  %v123_v59 = vld [vmem:[%s482_s2 + $0x20] sm:$0xff]  ;;  %s210_s14 = sshll.u32 %s321_s0, 4  ;;  %s211_s14 = int_to_ptr.vmem [resolvable:$true] %s210_s14 }
  0x14   :  { %v284_v54 = vpack.c.bf16 %v32_v53, %v31_v52  ;;  %v126_v57 = vld [vmem:[%s482_s2 + $0x38] sm:$0xff]  ;;  %v125_v60 = vld [vmem:[%s482_s2 + $0x30] sm:$0xff]  ;;  %s296_s15 = scalar_lea.vmem %s211_s14, 256  ;;  %p301_p1 = scmp.lt.s32.totalorder %s211_s14, %s211_s14 }
  0x15   :  { %273 = vmatpush3.bf16.msra.mxu0 %v272_v38  ;;  %v290_v58 = vpack.c.bf16 %v126_v57, %v124_v56  ;;  %v292_v61 = vpack.c.bf16 %v125_v60, %v123_v59  ;;  %p297_p0 = scmp.ne.s32.totalorder %s211_s14, %s296_s15  ;;  %p302_p2 = scmp.lt.s32.totalorder %s296_s15, %s296_s15 }
  0x16   :  { %275 = vmatprep.subr.bf16.mxu0 %v274_v39 }
  0x17   :  { %291 = vmatprep.subr.bf16.mxu1 %v290_v58  ;;  %p303_p3 = por %p302_p2, %p301_p1 }
  0x18   :  { %293 = vmatpush1.bf16.msra.mxu1 %v292_v61 }
  0x19   :  { %277 = vmatpush3.bf16.msra.mxu0 %v276_v44  ;;  %p304_p4 = pnand %p303_p3, %p297_p0 }
  0x1a   :  { %279 = vmatprep.subr.bf16.mxu0 %v278_v45 }
  0x1d   :  { %281 = vmatpush3.bf16.msra.mxu0 %v280_v50 }
  0x1e   :  { %283 = vmatprep.subr.bf16.mxu0 %v282_v51 }
  0x21   :  { %285 = vmatpush3.bf16.msra.mxu0 %v284_v54 }
  0x24   :  { %114 = vmatmul.mubr.f32.vlgmr.msra.gmra.mrb[0].mxu0 %v15_v55 }
  0xf7   :  { %v251_v63 = vpop.f32.mrb[0].mxu0 }
  0xf8   :  { %v252_v0 = vpop.f32.mrb[1].mxu0 }
  0xf9   :  { %v253_v1 = vadd.f32 %v252_v0, %v251_v63 }
  0xfb   :  { %218 = vmatmul.mubr.msk.f32.vlgmr.msra.gmra.mrb[0].mxu1 %vm127_vm0, %v253_v1 }
 0x1ce   :  { %v197_v2 = vpop.f32.mrb[0].mxu1 }
 0x1cf   :  { %202 = vst [vmem:[#allocation2] sm:$0xff] %v197_v2  ;;  %v199_v3 = vpop.f32.mrb[1].mxu1 }
 0x1d0   :  { %203 = vst [vmem:[#allocation2 + $0x8] sm:$0xff] %v199_v3 }
 0x1d1   :  { %307 = shalt.err (!%p304_p4)
}
 0x1d2   :  { %s308_s17 = scalar_lea.hbm %s483_s3, 256 }
 0x1d3   :  { %p309_p5 = scmp.ne.s32.totalorder %s483_s3, %s308_s17  ;;  %p312_p6 = scmp.lt.u32.totalorder %s308_s17, %s483_s3 }
 0x1d5   :  { %p314_p7 = pnand %p312_p6, %p309_p5 }
 0x1d7   :  { %317 = shalt.err (!%p314_p7)
}
 0x1d8   :  { %213 = dma.vmem_to_hbm [thread:$0]  %s211_s14, 256, %s483_s3, [#allocation3]  }
 0x1d9   :  { %318 = dma.done.wait [#allocation3], 256  }
 0x1da   :  { %319 = vsyncadd [#allocation3], 4294967040 }
 0x1db   :  { %217 = vsyncpa [#allocation3], 1 }

</bundles_post_ra>
